<compile_context>
chip_gen: v7x
topology: tpu7x:2x2x1
jax: 0.10.0
libtpu: 0.0.40
codegen_flags: <defaults>
</compile_context>

<pallas_src>
import jax
import jax.numpy as jnp
import numpy as np
from jax.experimental import pallas as pl
from jax.experimental.pallas import tpu as pltpu


def factorize(n: int, bias: int = 0):
    for i in range(int(np.sqrt(n)) + 1, 1, -1):
        if n % i == 0:
            if bias == 0:
                return [i, n // i]
            else:
                bias -= 1
    return [n, 1]


def _round_up(n: int, m: int) -> int:
    return ((n + m - 1) // m) * m


def kron_linear_kernel(x_ref, w_ref, bias_ref, o_ref):
    # x_ref    : (tm, lanes_in)           row tile of the (lane-folded) input
    # w_ref    : (lanes_in, lanes_out)    fused (block-diagonal) weight, resident
    # bias_ref : (1, lanes_out)           resident
    # o_ref    : (tm, lanes_out)          lane-dense output tile
    acc = jnp.dot(x_ref[...], w_ref[...], preferred_element_type=jnp.float32)
    o_ref[...] = (acc + bias_ref[...].astype(jnp.float32)).astype(o_ref.dtype)


def _fuse_kron_weight(a, b, s=None):
    """Exact effective dense weight of the PyTorch forward (any rank).

    Reproduces the torch permute/contiguous/view sequence (including the
    (rank*b2) reinterpretation quirk).
    """
    rank, a1, a2 = a.shape
    _, b1, b2 = b.shape
    a_eff = a if s is None else s[None, :, :] * a
    # b_mat[k, c*rank + r] = b[r, k, c]   (torch: b.permute(1,2,0).view(b1,-1))
    b_mat = jnp.transpose(b, (1, 2, 0)).reshape(b1, b2 * rank)
    # b_resh[r, c, k] = b_mat[k, r*b2 + c]  (the column order the torch .view sees)
    b_resh = jnp.transpose(b_mat.reshape(b1, rank, b2), (1, 2, 0))
    # W[i*b1+k, t*b2+c] = sum_r a_eff[r,i,t] * b_mat[k, r*b2+c]
    w = jnp.einsum('rit,rck->iktc', a_eff, b_resh).reshape(a1 * b1, a2 * b2)
    return w


def _vmem_limit_bytes():
    """Generation-aware scoped-VMEM limit (~48 MiB on v7x, ~96 MiB on v5e/v6e)."""
    cap = None
    try:
        cap = getattr(pltpu.get_tpu_info(), "vmem_capacity_bytes", None)
    except Exception:
        cap = None
    if not cap:
        cap = 64 * 1024 * 1024  # v7x per-TensorCore capacity = safe lower bound
    return int(min((cap * 3) // 4, 96 * 1024 * 1024))


def kron_linear_forward(x, a, b, bias=None, s=None):
    """Pallas implementation of KronLinear.forward."""
    rank, a1, a2 = a.shape
    _, b1, b2 = b.shape
    in_features = a1 * b1
    out_features = a2 * b2

    # ---- wrapper glue: fuse factors into one dense weight (tiny tensors) ----
    w = _fuse_kron_weight(a, b, s).astype(x.dtype)
    if bias is None:
        bias = jnp.zeros((out_features,), dtype=x.dtype)
    bias = bias.astype(x.dtype)

    x_shape = x.shape
    x_flat = x.reshape(-1, in_features)
    m = x_flat.shape[0]

    itemsize = jnp.dtype(x.dtype).itemsize
    sub = 8 * max(1, 4 // itemsize)  # packed sublane multiple: 8 f32 / 16 bf16 / 32 int8

    # ---- lane-fold: pack g rows into the lane dim (block-diagonal weight) ----
    g = max(1, 128 // max(in_features, out_features))
    if g > 1 and m % g == 0:
        x_rows = x_flat.reshape(m // g, g * in_features)  # free, contiguous reshape
        eye = jnp.eye(g, dtype=w.dtype)
        w_k = jnp.einsum('gh,io->giho', eye, w).reshape(g * in_features, g * out_features)
        bias_k = jnp.tile(bias, (g,))
    else:
        g = 1
        x_rows = x_flat
        w_k = w
        bias_k = bias
    lanes_in = g * in_features
    lanes_out = g * out_features
    m_rows = x_rows.shape[0]
    bias_k = bias_k.reshape(1, lanes_out)

    # ---- tiny pad only when the row count is below one sublane group ----
    m_p = m_rows
    if m_rows < sub:
        m_p = sub
        x_rows = jnp.pad(x_rows, ((0, m_p - m_rows), (0, 0)))

    # ---- budget-driven row tile; resident W/bias accounted (double-buffered) ----
    vmem_limit = _vmem_limit_bytes()
    resident = 2 * (lanes_in * lanes_out + sub * lanes_out) * itemsize
    headroom = 4 * 1024 * 1024
    budget = vmem_limit - resident - headroom
    per_row = 2 * (lanes_in + lanes_out) * itemsize  # double-buffered x-in + out
    # TODO(synk): add K/N grid tiling with an f32 accumulator scratch for layers
    # whose fused W would not fit the VMEM budget (not reachable for this config).
    tm = max(sub, (budget // per_row) // sub * sub) if budget > per_row * sub else sub
    tm = min(tm, (m_p // sub) * sub)
    tm = max(sub, tm)
    # v7x megacore: give the parallel grid axis >= 2 steps whenever possible.
    if pl.cdiv(m_p, tm) == 1 and m_p >= 2 * sub:
        tm = _round_up(pl.cdiv(m_p, 2), sub)

    grid_m = pl.cdiv(m_p, tm)  # ragged final block is masked by Pallas

    out = pl.pallas_call(
        kron_linear_kernel,
        out_shape=jax.ShapeDtypeStruct((m_p, lanes_out), x.dtype),
        grid_spec=pltpu.PrefetchScalarGridSpec(
            num_scalar_prefetch=0,
            grid=(grid_m,),
            in_specs=[
                pl.BlockSpec((tm, lanes_in), lambda i: (i, 0)),
                # Constant index_map -> W / bias are DMA'd once and stay resident.
                # Their (worst-case double-buffered) footprint is charged to the
                # VMEM budget above; pipeline_mode=pl.Buffered(1) is deliberately
                # not used to stay compatible across jax versions.
                pl.BlockSpec((lanes_in, lanes_out), lambda i: (0, 0)),
                pl.BlockSpec((1, lanes_out), lambda i: (0, 0)),
            ],
            out_specs=pl.BlockSpec((tm, lanes_out), lambda i: (i, 0)),
        ),
        compiler_params=pltpu.CompilerParams(
            dimension_semantics=("parallel",),
            vmem_limit_bytes=vmem_limit,
        ),
    )(x_rows, w_k, bias_k)

    if m_p != m_rows:
        out = out[:m_rows]
    return out.reshape(x_shape[:-1] + (out_features,))


def kron_linear_reference(x, a, b, bias, s=None):
    """Pure-JAX transcription of the PyTorch forward (for verification)."""
    rank, a1, a2d = a.shape
    _, b1, b2 = b.shape
    a_eff = a if s is None else s[None, :, :] * a
    x_shape = x.shape
    xf = x.reshape(-1, x_shape[-1])
    bm = jnp.transpose(b, (1, 2, 0)).reshape(b1, -1)
    x3 = xf.reshape(-1, a1, b1)
    out = x3 @ bm
    out = out.reshape(-1, a1, rank, b2)
    out = jnp.transpose(out, (2, 0, 3, 1))
    out = out.reshape(rank, -1, a1)
    out = jnp.einsum('rma,rat->rmt', out, a_eff)
    out = jnp.sum(out, axis=0)
    out = out.reshape(-1, b2, a2d)
    out = jnp.transpose(out, (0, 2, 1))
    out = out.reshape(x_shape[:-1] + (a2d * b2,))
    return out + bias[None]


if __name__ == "__main__":
    # Module config: KronLinear(in_features=32, out_features=32)
    in_features, out_features = 32, 32
    in_shape = factorize(in_features)      # [4, 8]
    out_shape = factorize(out_features)    # [4, 8]
    a_shape = (in_shape[0], out_shape[0])  # (4, 4)
    b_shape = (in_shape[1], out_shape[1])  # (8, 8)

    key = jax.random.PRNGKey(0)

    def make_params(key, rank):
        k_a, k_b, k_bias, k_s = jax.random.split(key, 4)
        bound_a = float(np.sqrt(6.0 / (a_shape[0] * a_shape[1] + rank * a_shape[1])))
        bound_b = float(np.sqrt(6.0 / (b_shape[0] * b_shape[1] + rank * b_shape[1])))
        a = jax.random.uniform(k_a, (rank,) + a_shape, jnp.float32, -bound_a, bound_a)
        b = jax.random.uniform(k_b, (rank,) + b_shape, jnp.float32, -bound_b, bound_b)
        bias = jax.random.normal(k_bias, (out_features,), jnp.float32)
        s = jax.random.normal(k_s, a_shape, jnp.float32)
        return a, b, bias, s

    k1, k2, k3, kx1, kx2 = jax.random.split(key, 5)

    # --- case 1: rank = 1 (module default rank_rate path), lane-fold path ---
    a, b, bias, _ = make_params(k1, rank=1)
    x = jax.random.normal(kx1, (2, 8, in_features), jnp.float32)
    out = jax.block_until_ready(kron_linear_forward(x, a, b, bias))
    ref = kron_linear_reference(x, a, b, bias)
    np.testing.assert_allclose(np.asarray(out), np.asarray(ref), rtol=1e-2, atol=1e-2)
    assert out.shape == x.shape[:-1] + (out_features,)

    # --- case 2: rank = 2, batch that does not tile evenly (ragged grid path) ---
    a2p, b2p, bias2p, _ = make_params(k2, rank=2)
    x2 = jax.random.normal(kx2, (2, 7, in_features), jnp.float32)
    out2 = jax.block_until_ready(kron_linear_forward(x2, a2p, b2p, bias2p))
    ref2 = kron_linear_reference(x2, a2p, b2p, bias2p)
    np.testing.assert_allclose(np.asarray(out2), np.asarray(ref2), rtol=1e-2, atol=1e-2)

    # --- case 3: structured_sparse (s * a) path, rank = 1 ---
    a3p, b3p, bias3p, s3 = make_params(k3, rank=1)
    out3 = jax.block_until_ready(kron_linear_forward(x, a3p, b3p, bias3p, s=s3))
    ref3 = kron_linear_reference(x, a3p, b3p, bias3p, s=s3)
    np.testing.assert_allclose(np.asarray(out3), np.asarray(ref3), rtol=1e-2, atol=1e-2)

    print("KERNEL_OK")
</pallas_src>

<mosaic_0001>
module attributes {stable_mosaic.version = 11 : i64} {
  func.func @kron_linear_kernel(%arg0: i32, %arg1: memref<8x128xf32, #tpu.memory_space<vmem>>, %arg2: memref<128x128xf32, #tpu.memory_space<vmem>>, %arg3: memref<1x128xf32, #tpu.memory_space<vmem>>, %arg4: memref<8x128xf32, #tpu.memory_space<vmem>>) attributes {dimension_semantics = [#tpu.dimension_semantics<parallel>], iteration_bounds = array<i64: 1>, scalar_prefetch = 0 : i64, scratch_operands = 0 : i64, tpu.core_type = #tpu.core_type<tc>, window_params = [{transform_indices = @transform_0, window_bounds = array<i64: 8, 128>}, {pipeline_mode = #tpu.pipeline_mode<synchronous>, transform_indices = @transform_1, window_bounds = array<i64: 128, 128>}, {pipeline_mode = #tpu.pipeline_mode<synchronous>, transform_indices = @transform_2, window_bounds = array<i64: 1, 128>}, {transform_indices = @transform_3, window_bounds = array<i64: 8, 128>}]} {
    %c0 = arith.constant 0 : index
    %c0_0 = arith.constant 0 : index
    %0 = vector.load %arg1[%c0, %c0_0] : memref<8x128xf32, #tpu.memory_space<vmem>>, vector<8x128xf32>
    %c0_1 = arith.constant 0 : index
    %c0_2 = arith.constant 0 : index
    %1 = vector.load %arg2[%c0_1, %c0_2] : memref<128x128xf32, #tpu.memory_space<vmem>>, vector<128x128xf32>
    %cst = arith.constant dense<0.000000e+00> : vector<8x128xf32>
    %2 = tpu.matmul %0, %1, %cst {dimension_numbers = #tpu.dot_dimension_numbers<[1], [0], [0], [1], [0, 0, 1, 1], [], []>} : vector<8x128xf32>, vector<128x128xf32>, vector<8x128xf32> -> vector<8x128xf32>
    %c0_3 = arith.constant 0 : index
    %c0_4 = arith.constant 0 : index
    %3 = vector.load %arg3[%c0_3, %c0_4] : memref<1x128xf32, #tpu.memory_space<vmem>>, vector<1x128xf32>
    %4 = vector.broadcast %3 : vector<1x128xf32> to vector<8x128xf32>
    %5 = arith.addf %2, %4 : vector<8x128xf32>
    %c0_5 = arith.constant 0 : index
    %c0_6 = arith.constant 0 : index
    %6 = vector.load %arg4[%c0_5, %c0_6] : memref<8x128xf32, #tpu.memory_space<vmem>>, vector<8x128xf32>
    tpu.vector_store %arg4[%c0_5, %c0_6], %5 {strides = array<i32>} : memref<8x128xf32, #tpu.memory_space<vmem>>, vector<8x128xf32>,
    return
  }
  func.func @transform_0(%arg0: i32) -> (i32, i32) {
    %c0_i32 = arith.constant 0 : i32
    %c0_i32_0 = arith.constant 0 : i32
    return %arg0, %c0_i32 : i32, i32
  }
  func.func @transform_1(%arg0: i32) -> (i32, i32) {
    %c0_i32 = arith.constant 0 : i32
    %c0_i32_0 = arith.constant 0 : i32
    %c0_i32_1 = arith.constant 0 : i32
    return %c0_i32, %c0_i32_0 : i32, i32
  }
  func.func @transform_2(%arg0: i32) -> (i32, i32) {
    %c0_i32 = arith.constant 0 : i32
    %c0_i32_0 = arith.constant 0 : i32
    %c0_i32_1 = arith.constant 0 : i32
    return %c0_i32, %c0_i32_0 : i32, i32
  }
  func.func @transform_3(%arg0: i32) -> (i32, i32) {
    %c0_i32 = arith.constant 0 : i32
    %c0_i32_0 = arith.constant 0 : i32
    return %arg0, %c0_i32 : i32, i32
  }
}

</mosaic_0001>

<bundles_post_ra>
// kernel: tpu_custom_call.1
= control target key start
LH: loop header
LB: loop body
LE: loop exit
PB: predicated region body
PF: predicated region fallthrough
CT: control target
= control target key end

     0   :  { %8 = vsyncpa [#allocation3], 0  ;;  %s383_s0 = inlined_call_operand.hbm [shape: f32[8,128], index: 0, kind: input, shape index: {}]   ;;  %s384_s1 = inlined_call_operand.hbm [shape: f32[128,128], index: 1, kind: input, shape index: {}]   ;;  %s385_s2 = inlined_call_operand.vmem [shape: f32[1,128], index: 2, kind: input, shape index: {}]   ;;  %s386_s3 = inlined_call_operand.hbm [shape: f32[8,128], index: 3, kind: output, shape index: {}]  }
   0x1   :  { %9 = vsyncpa [#allocation6], 0 }
   0x2   :  { %10 = vsyncpa [#allocation4], 0  ;;  %s309_s12 = smov [#allocation2]   ;;  %s310_s14 = smov [#allocation5]  }
   0x3   :  { %s17_s13 = sshll.u32 %s309_s12, 4  ;;  %s26_s15 = sshll.u32 %s310_s14, 4  ;;  %s18_s13 = int_to_ptr.vmem [resolvable:$true] %s17_s13  ;;  %s337_s15 = int_to_ptr.vmem [resolvable:$true] %s26_s15 }
   0x4   :  { %s237_s18 = scalar_lea.hbm %s383_s0, 128 }
   0x5   :  { %p238_p0 = scmp.ne.s32.totalorder %s383_s0, %s237_s18  ;;  %p241_p1 = scmp.lt.u32.totalorder %s237_s18, %s383_s0 }
   0x7   :  { %p243_p2 = pnand %p241_p1, %p238_p0 }
   0x9   :  { %246 = shalt.err (!%p243_p2)
}
   0xa   :  { %s247_s23 = scalar_lea.vmem %s18_s13, 128  ;;  %p252_p4 = scmp.lt.s32.totalorder %s18_s13, %s18_s13 }
   0xb   :  { %p248_p3 = scmp.ne.s32.totalorder %s18_s13, %s247_s23  ;;  %p253_p5 = scmp.lt.s32.totalorder %s247_s23, %s247_s23 }
   0xd   :  { %p254_p6 = por %p253_p5, %p252_p4 }
   0xf   :  { %p255_p7 = pnand %p254_p6, %p248_p3 }
  0x11   :  { %258 = shalt.err (!%p255_p7)
}
  0x12   :  { %20 = dma.hbm_to_vmem [thread:$0]  %s383_s0, 128, %s18_s13, [#allocation3]  }
  0x13   :  { %s259_s28 = scalar_lea.hbm %s384_s1, 2048 }
  0x14   :  { %p260_p8 = scmp.ne.s32.totalorder %s384_s1, %s259_s28  ;;  %p263_p9 = scmp.lt.u32.totalorder %s259_s28, %s384_s1 }
  0x16   :  { %p265_p10 = pnand %p263_p9, %p260_p8 }
  0x18   :  { %268 = shalt.err (!%p265_p10)
}
  0x19   :  { %s269_s6 = scalar_lea.vmem %s337_s15, 2048  ;;  %p274_p12 = scmp.lt.s32.totalorder %s337_s15, %s337_s15 }
  0x1a   :  { %p270_p11 = scmp.ne.s32.totalorder %s337_s15, %s269_s6  ;;  %p275_p13 = scmp.lt.s32.totalorder %s269_s6, %s269_s6 }
  0x1c   :  { %p276_p0 = por %p275_p13, %p274_p12 }
  0x1e   :  { %p277_p1 = pnand %p276_p0, %p270_p11 }
  0x20   :  { %280 = shalt.err (!%p277_p1)
}
  0x21   :  { %s311_s0 = smov 128   ;;  %s312_s7 = smov 8  }
  0x22   :  { %32 = dma.hbm_to_vmem [thread:$0]  %s384_s1, 2048, %s337_s15, [#allocation6], %s311_s0, %s311_s0, %s312_s7  }
  0x23   :  { %303 = dma.done.wait [#allocation3], 128  }
  0x24   :  { %304 = vsyncadd [#allocation3], 4294967168 }
  0x25   :  { %305 = dma.done.wait [#allocation6], 2048  }
  0x26   :  { %306 = vsyncadd [#allocation6], 4294965248  ;;  %v313_v0 = vmov 0.0|0.0   ;;  %vm314_vm0 = vmmov 0   ;;  %v315_v1 = vmov 0.0   ;;  %v42_v2 = vld [vmem:[#allocation5] sm:$0xff] }
  0x27   :  { %205 = vmatprep.subr.bf16.mxu0 %v313_v0  ;;  %202 = vmatprep.mubr.msk.f32.mxu0 %vm314_vm0, %v315_v1  ;;  %v43_v3 = vld [vmem:[#allocation5 + $0x8] sm:$0xff]  ;;  %v44_v4 = vld [vmem:[#allocation5 + $0x10] sm:$0xff]  ;;  %v45_v6 = vld [vmem:[#allocation5 + $0x18] sm:$0xff]  ;;  %s316_s11 = smov [#allocation7]  }
  0x28   :  { %v206_v5 = vpack.c.bf16 %v43_v3, %v42_v2  ;;  %v209_v7 = vpack.c.bf16 %v45_v6, %v44_v4  ;;  %v46_v8 = vld [vmem:[#allocation5 + $0x20] sm:$0xff]  ;;  %v47_v9 = vld [vmem:[#allocation5 + $0x28] sm:$0xff]  ;;  %v48_v11 = vld [vmem:[#allocation5 + $0x30] sm:$0xff]  ;;  %s142_s12 = sshll.u32 %s316_s11, 4  ;;  %s143_s12 = int_to_ptr.vmem [resolvable:$true] %s142_s12 }
  0x29   :  { %v212_v10 = vpack.c.bf16 %v47_v9, %v46_v8  ;;  %v49_v12 = vld [vmem:[#allocation5 + $0x38] sm:$0xff]  ;;  %v50_v14 = vld [vmem:[#allocation5 + $0x40] sm:$0xff]  ;;  %v51_v15 = vld [vmem:[#allocation5 + $0x48] sm:$0xff]  ;;  %s281_s13 = scalar_lea.vmem %s143_s12, 128  ;;  %p286_p3 = scmp.lt.s32.totalorder %s143_s12, %s143_s12 }
  0x2a   :  { %207 = vmatpush3.bf16.msra.mxu0 %v206_v5  ;;  %v215_v13 = vpack.c.bf16 %v49_v12, %v48_v11  ;;  %v218_v16 = vpack.c.bf16 %v51_v15, %v50_v14  ;;  %v52_v17 = vld [vmem:[#allocation5 + $0x50] sm:$0xff]  ;;  %v53_v18 = vld [vmem:[#allocation5 + $0x58] sm:$0xff]  ;;  %v54_v20 = vld [vmem:[#allocation5 + $0x60] sm:$0xff]  ;;  %p282_p2 = scmp.ne.s32.totalorder %s143_s12, %s281_s13  ;;  %p287_p4 = scmp.lt.s32.totalorder %s281_s13, %s281_s13 }
  0x2b   :  { %208 = vmatprep.subr.bf16.mxu0 %v313_v0  ;;  %v221_v19 = vpack.c.bf16 %v53_v18, %v52_v17  ;;  %v55_v21 = vld [vmem:[#allocation5 + $0x68] sm:$0xff]  ;;  %v56_v23 = vld [vmem:[#allocation5 + $0x70] sm:$0xff]  ;;  %v57_v24 = vld [vmem:[#allocation5 + $0x78] sm:$0xff] }
  0x2c   :  { %v224_v22 = vpack.c.bf16 %v55_v21, %v54_v20  ;;  %v227_v25 = vpack.c.bf16 %v57_v24, %v56_v23  ;;  %v41_v26 = vld [vmem:[#allocation2] sm:$0xff]  ;;  %p288_p5 = por %p287_p4, %p286_p3 }
  0x2d   :  { %v152_v27 = vld [vmem:[%s385_s2] ss:$0 sm:$0xff] }
  0x2e   :  { %210 = vmatpush3.bf16.msra.mxu0 %v209_v7  ;;  %p289_p6 = pnand %p288_p5, %p282_p2 }
  0x2f   :  { %211 = vmatprep.subr.bf16.mxu0 %v313_v0 }
  0x32   :  { %213 = vmatpush3.bf16.msra.mxu0 %v212_v10 }
  0x33   :  { %214 = vmatprep.subr.bf16.mxu0 %v313_v0 }
  0x36   :  { %216 = vmatpush3.bf16.msra.mxu0 %v215_v13 }
  0x37   :  { %217 = vmatprep.subr.bf16.mxu0 %v313_v0 }
  0x3a   :  { %219 = vmatpush3.bf16.msra.mxu0 %v218_v16 }
  0x3b   :  { %220 = vmatprep.subr.bf16.mxu0 %v313_v0 }
  0x3e   :  { %222 = vmatpush3.bf16.msra.mxu0 %v221_v19 }
  0x3f   :  { %223 = vmatprep.subr.bf16.mxu0 %v313_v0 }
  0x42   :  { %225 = vmatpush3.bf16.msra.mxu0 %v224_v22 }
  0x43   :  { %226 = vmatprep.subr.bf16.mxu0 %v313_v0 }
  0x46   :  { %228 = vmatpush3.bf16.msra.mxu0 %v227_v25 }
  0x49   :  { %203 = vmatmul.mubr.f32.vlgmr.msra.gmra.mrb[0].mxu0 %v41_v26 }
 0x11c   :  { %v131_v28 = vpop.f32.mrb[0].mxu0 }
 0x11d   :  { %v132_v29 = vadd.f32 %v152_v27, %v131_v28  ;;  %v204_v30 = vpop.f32.mrb[1].mxu0 }
 0x11f   :  { %135 = vst [vmem:[#allocation7] sm:$0xff] %v132_v29 }
 0x120   :  { %292 = shalt.err (!%p289_p6)
}
 0x121   :  { %s293_s16 = scalar_lea.hbm %s386_s3, 128 }
 0x122   :  { %p294_p7 = scmp.ne.s32.totalorder %s386_s3, %s293_s16  ;;  %p297_p8 = scmp.lt.u32.totalorder %s293_s16, %s386_s3 }
 0x124   :  { %p299_p9 = pnand %p297_p8, %p294_p7 }
 0x126   :  { %302 = shalt.err (!%p299_p9)
}
 0x127   :  { %145 = dma.vmem_to_hbm [thread:$0]  %s143_s12, 128, %s386_s3, [#allocation4]  }
 0x128   :  { %307 = dma.done.wait [#allocation4], 128  }
 0x129   :  { %308 = vsyncadd [#allocation4], 4294967168 }
 0x12a   :  { %149 = vsyncpa [#allocation3], 1 }
 0x12b   :  { %150 = vsyncpa [#allocation6], 1 }
 0x12c   :  { %151 = vsyncpa [#allocation4], 1 }

</bundles_post_ra>
